<compile_context>
chip_gen: v7x
topology: tpu7x:2x2x1
jax: 0.10.0
libtpu: 0.0.40
codegen_flags: <defaults>
</compile_context>

<pallas_src>
import jax
import jax.numpy as jnp
from jax.experimental import pallas as pl
from jax.experimental.pallas import tpu as pltpu


STATE_DIM = 59               # 2*29 stocks + 1 balance
ACTION_DIM = 29
IN_DIM = STATE_DIM + ACTION_DIM   # 88 (hard-coded in the PyTorch module)
HIDDEN = 256
OUT_DIM = 1
W3_PAD = 128                 # layer-3 weight zero-padded to a full lane tile (MXU path)

TB_MAX = 2048                # batch tile (rows)
ROW_ALIGN = 16               # bf16-native (16,128) sublane packing


def _round_up(x, m):
    return -(-x // m) * m


def _critic_kernel(s_ref, a_ref, w1s_ref, w1a_ref, b1_ref,
                   w2_ref, b2_ref, w3_ref, b3_ref, o_ref):
    # s_ref : (TB, 59)  f32        a_ref : (TB, 29)  f32
    # w1s   : (59, 256) cdt        w1a   : (29, 256) cdt     b1: (1, 256) cdt
    # w2    : (256,256) cdt        b2    : (1, 256)  cdt
    # w3    : (256,128) cdt (only col 0 nonzero)              b3: (1, 1) f32
    # o_ref : (TB, 1)   f32
    cdt = w2_ref.dtype  # compute dtype (bf16 default, f32 for numerics debug)

    s = s_ref[...].astype(cdt)
    a = a_ref[...].astype(cdt)

    # Layer 1: split matmul (replaces wrapper-side concat); f32 MXU accumulation.
    h1f = (jnp.dot(s, w1s_ref[...], preferred_element_type=jnp.float32)
           + jnp.dot(a, w1a_ref[...], preferred_element_type=jnp.float32))
    h1 = jnp.maximum(h1f.astype(cdt) + b1_ref[...], 0)

    # Layer 2
    h2f = jnp.dot(h1, w2_ref[...], preferred_element_type=jnp.float32)
    h2 = jnp.maximum(h2f.astype(cdt) + b2_ref[...], 0)

    # Layer 3 on the MXU (third matmul is free; VPU/XLU stay unloaded).
    q = jnp.dot(h2, w3_ref[...], preferred_element_type=jnp.float32)  # (TB, 128)
    o_ref[...] = (q[:, :OUT_DIM] + b3_ref[...]).astype(o_ref.dtype)   # (TB, 1) writeback


def prepare_critic_params(params, compute_dtype=jnp.bfloat16):
    """One-time parameter prep: split / pad / reshape / cast (hoisted out of forward)."""
    w1, b1, w2, b2, w3, b3 = params
    w1c = w1.astype(compute_dtype)
    w1s = w1c[:STATE_DIM]                                              # (59, 256)
    w1a = w1c[STATE_DIM:]                                              # (29, 256)
    b1p = b1.reshape(1, HIDDEN).astype(compute_dtype)                  # (1, 256)
    w2p = w2.astype(compute_dtype)                                     # (256, 256)
    b2p = b2.reshape(1, HIDDEN).astype(compute_dtype)                  # (1, 256)
    w3p = jnp.pad(w3.astype(compute_dtype), ((0, 0), (0, W3_PAD - OUT_DIM)))  # (256,128)
    b3p = b3.reshape(1, 1).astype(jnp.float32)                         # (1, 1)
    return (w1s, w1a, b1p, w2p, b2p, w3p, b3p)


@jax.jit
def critic_forward(state, action, prepared_params):
    """Pallas implementation of Critic.forward(state, action) -> (B, 1) f32."""
    w1s, w1a, b1p, w2p, b2p, w3p, b3p = prepared_params
    B = state.shape[0]

    # Batch tiling: single tile for small B; exactly 2 tiles in the mid range so
    # megacore (v7x) gets >= 2 grid steps; TB_MAX tiles beyond that.
    if B <= TB_MAX:
        tb = _round_up(max(B, ROW_ALIGN), ROW_ALIGN)
    elif B <= 2 * TB_MAX:
        tb = _round_up(-(-B // 2), ROW_ALIGN)
    else:
        tb = TB_MAX
    b_pad = _round_up(B, tb)
    nb = b_pad // tb

    if b_pad != B:  # row-only padding (no feature pad, no dtype cast in the wrapper)
        state = jnp.pad(state, ((0, b_pad - B), (0, 0)))
        action = jnp.pad(action, ((0, b_pad - B), (0, 0)))

    flops = 2 * B * (IN_DIM * HIDDEN + HIDDEN * HIDDEN + HIDDEN * OUT_DIM)
    bytes_accessed = (B * IN_DIM * 4 + B * OUT_DIM * 4
                      + sum(int(p.size) * p.dtype.itemsize for p in prepared_params))

    out_pad = pl.pallas_call(
        _critic_kernel,
        out_shape=jax.ShapeDtypeStruct((b_pad, OUT_DIM), jnp.float32),
        grid=(nb,),
        in_specs=[
            pl.BlockSpec((tb, STATE_DIM), lambda i: (i, 0)),      # state: batch-tiled, f32
            pl.BlockSpec((tb, ACTION_DIM), lambda i: (i, 0)),     # action: batch-tiled, f32
            pl.BlockSpec((STATE_DIM, HIDDEN), lambda i: (0, 0)),  # w1 (state rows), resident
            pl.BlockSpec((ACTION_DIM, HIDDEN), lambda i: (0, 0)), # w1 (action rows), resident
            pl.BlockSpec((1, HIDDEN), lambda i: (0, 0)),          # b1
            pl.BlockSpec((HIDDEN, HIDDEN), lambda i: (0, 0)),     # w2, resident
            pl.BlockSpec((1, HIDDEN), lambda i: (0, 0)),          # b2
            pl.BlockSpec((HIDDEN, W3_PAD), lambda i: (0, 0)),     # w3 padded, resident
            pl.BlockSpec((1, 1), lambda i: (0, 0)),               # b3
        ],
        out_specs=pl.BlockSpec((tb, OUT_DIM), lambda i: (i, 0)),
        compiler_params=pltpu.CompilerParams(
            dimension_semantics=("parallel",),        # megacore sharding over batch tiles
            vmem_limit_bytes=32 * 1024 * 1024,
        ),
        cost_estimate=pl.CostEstimate(
            flops=flops, transcendentals=0, bytes_accessed=bytes_accessed),
    )(state, action, w1s, w1a, b1p, w2p, b2p, w3p, b3p)

    return out_pad[:B]


def init_critic_params(key):
    """Deterministic PyTorch-Linear-style init: U(-1/sqrt(fan_in), 1/sqrt(fan_in))."""
    ks = jax.random.split(key, 6)

    def linear(kw, kb, fan_in, fan_out):
        bound = 1.0 / jnp.sqrt(fan_in)
        w = jax.random.uniform(kw, (fan_in, fan_out), jnp.float32, -bound, bound)
        b = jax.random.uniform(kb, (fan_out,), jnp.float32, -bound, bound)
        return w, b

    w1, b1 = linear(ks[0], ks[1], IN_DIM, HIDDEN)
    w2, b2 = linear(ks[2], ks[3], HIDDEN, HIDDEN)
    w3, b3 = linear(ks[4], ks[5], HIDDEN, OUT_DIM)
    return (w1, b1, w2, b2, w3, b3)


def critic_reference(state, action, params):
    """Pure-JAX f32 reference for correctness check."""
    w1, b1, w2, b2, w3, b3 = params
    x = jnp.concatenate([state, action], axis=1)
    h1 = jnp.maximum(x @ w1 + b1, 0.0)
    h2 = jnp.maximum(h1 @ w2 + b2, 0.0)
    return h2 @ w3 + b3


if __name__ == "__main__":
    key = jax.random.PRNGKey(0)
    k_params, k_state, k_action = jax.random.split(key, 3)

    # 29 stocks -> state_dim = 2*29 + 1 = 59, action_dim = 29, total = 88.
    batch = 2
    params = init_critic_params(k_params)
    state = jax.random.normal(k_state, (batch, STATE_DIM), jnp.float32)
    action = jax.random.normal(k_action, (batch, ACTION_DIM), jnp.float32)

    ref = critic_reference(state, action, params)

    # f32 numerics-debug path: tight tolerance.
    p_f32 = prepare_critic_params(params, jnp.float32)
    out_f32 = jax.block_until_ready(critic_forward(state, action, p_f32))
    assert out_f32.shape == (batch, 1), out_f32.shape
    assert jnp.allclose(out_f32, ref, atol=1e-4, rtol=1e-4), (out_f32, ref)

    # bf16 default path (all generations): relaxed tolerance, f32 MXU accumulation.
    p_bf16 = prepare_critic_params(params, jnp.bfloat16)
    out_bf16 = jax.block_until_ready(critic_forward(state, action, p_bf16))
    assert out_bf16.shape == (batch, 1), out_bf16.shape
    assert jnp.allclose(out_bf16, ref, atol=5e-2, rtol=5e-2), (out_bf16, ref)

    print("KERNEL_OK")
</pallas_src>

<mosaic_0001>
module attributes {stable_mosaic.version = 11 : i64} {
  func.func @_critic_kernel(%arg0: i32, %arg1: memref<16x59xf32, #tpu.memory_space<vmem>>, %arg2: memref<16x29xf32, #tpu.memory_space<vmem>>, %arg3: memref<59x256xf32, #tpu.memory_space<vmem>>, %arg4: memref<29x256xf32, #tpu.memory_space<vmem>>, %arg5: memref<1x256xf32, #tpu.memory_space<vmem>>, %arg6: memref<256x256xf32, #tpu.memory_space<vmem>>, %arg7: memref<1x256xf32, #tpu.memory_space<vmem>>, %arg8: memref<256x128xf32, #tpu.memory_space<vmem>>, %arg9: memref<1x1xf32, #tpu.memory_space<vmem>>, %arg10: memref<16x1xf32, #tpu.memory_space<vmem>>) attributes {dimension_semantics = [#tpu.dimension_semantics<parallel>], iteration_bounds = array<i64: 1>, scalar_prefetch = 0 : i64, scratch_operands = 0 : i64, tpu.core_type = #tpu.core_type<tc>, window_params = [{transform_indices = @transform_0, window_bounds = array<i64: 16, 59>}, {transform_indices = @transform_1, window_bounds = array<i64: 16, 29>}, {pipeline_mode = #tpu.pipeline_mode<synchronous>, transform_indices = @transform_2, window_bounds = array<i64: 59, 256>}, {pipeline_mode = #tpu.pipeline_mode<synchronous>, transform_indices = @transform_3, window_bounds = array<i64: 29, 256>}, {pipeline_mode = #tpu.pipeline_mode<synchronous>, transform_indices = @transform_4, window_bounds = array<i64: 1, 256>}, {pipeline_mode = #tpu.pipeline_mode<synchronous>, transform_indices = @transform_5, window_bounds = array<i64: 256, 256>}, {pipeline_mode = #tpu.pipeline_mode<synchronous>, transform_indices = @transform_6, window_bounds = array<i64: 1, 256>}, {pipeline_mode = #tpu.pipeline_mode<synchronous>, transform_indices = @transform_7, window_bounds = array<i64: 256, 128>}, {pipeline_mode = #tpu.pipeline_mode<synchronous>, transform_indices = @transform_8, window_bounds = array<i64: 1, 1>}, {transform_indices = @transform_9, window_bounds = array<i64: 16, 1>}]} {
    %c0 = arith.constant 0 : index
    %c0_0 = arith.constant 0 : index
    %0 = vector.load %arg1[%c0, %c0_0] : memref<16x59xf32, #tpu.memory_space<vmem>>, vector<16x59xf32>
    %c0_1 = arith.constant 0 : index
    %c0_2 = arith.constant 0 : index
    %1 = vector.load %arg2[%c0_1, %c0_2] : memref<16x29xf32, #tpu.memory_space<vmem>>, vector<16x29xf32>
    %c0_3 = arith.constant 0 : index
    %c0_4 = arith.constant 0 : index
    %2 = vector.load %arg3[%c0_3, %c0_4] : memref<59x256xf32, #tpu.memory_space<vmem>>, vector<59x256xf32>
    %cst = arith.constant dense<0.000000e+00> : vector<16x256xf32>
    %3 = tpu.matmul %0, %2, %cst {dimension_numbers = #tpu.dot_dimension_numbers<[1], [0], [0], [1], [0, 0, 1, 1], [], []>} : vector<16x59xf32>, vector<59x256xf32>, vector<16x256xf32> -> vector<16x256xf32>
    %c0_5 = arith.constant 0 : index
    %c0_6 = arith.constant 0 : index
    %4 = vector.load %arg4[%c0_5, %c0_6] : memref<29x256xf32, #tpu.memory_space<vmem>>, vector<29x256xf32>
    %cst_7 = arith.constant dense<0.000000e+00> : vector<16x256xf32>
    %5 = tpu.matmul %1, %4, %cst_7 {dimension_numbers = #tpu.dot_dimension_numbers<[1], [0], [0], [1], [0, 0, 1, 1], [], []>} : vector<16x29xf32>, vector<29x256xf32>, vector<16x256xf32> -> vector<16x256xf32>
    %6 = arith.addf %3, %5 : vector<16x256xf32>
    %c0_8 = arith.constant 0 : index
    %c0_9 = arith.constant 0 : index
    %7 = vector.load %arg5[%c0_8, %c0_9] : memref<1x256xf32, #tpu.memory_space<vmem>>, vector<1x256xf32>
    %8 = vector.broadcast %7 : vector<1x256xf32> to vector<16x256xf32>
    %9 = arith.addf %6, %8 : vector<16x256xf32>
    %cst_10 = arith.constant 0.000000e+00 : f32
    %10 = vector.broadcast %cst_10 : f32 to vector<16x256xf32>
    %11 = arith.maximumf %9, %10 : vector<16x256xf32>
    %c0_11 = arith.constant 0 : index
    %c0_12 = arith.constant 0 : index
    %12 = vector.load %arg6[%c0_11, %c0_12] : memref<256x256xf32, #tpu.memory_space<vmem>>, vector<256x256xf32>
    %cst_13 = arith.constant dense<0.000000e+00> : vector<16x256xf32>
    %13 = tpu.matmul %11, %12, %cst_13 {dimension_numbers = #tpu.dot_dimension_numbers<[1], [0], [0], [1], [0, 0, 1, 1], [], []>} : vector<16x256xf32>, vector<256x256xf32>, vector<16x256xf32> -> vector<16x256xf32>
    %c0_14 = arith.constant 0 : index
    %c0_15 = arith.constant 0 : index
    %14 = vector.load %arg7[%c0_14, %c0_15] : memref<1x256xf32, #tpu.memory_space<vmem>>, vector<1x256xf32>
    %15 = vector.broadcast %14 : vector<1x256xf32> to vector<16x256xf32>
    %16 = arith.addf %13, %15 : vector<16x256xf32>
    %cst_16 = arith.constant 0.000000e+00 : f32
    %17 = vector.broadcast %cst_16 : f32 to vector<16x256xf32>
    %18 = arith.maximumf %16, %17 : vector<16x256xf32>
    %c0_17 = arith.constant 0 : index
    %c0_18 = arith.constant 0 : index
    %19 = vector.load %arg8[%c0_17, %c0_18] : memref<256x128xf32, #tpu.memory_space<vmem>>, vector<256x128xf32>
    %cst_19 = arith.constant dense<0.000000e+00> : vector<16x128xf32>
    %20 = tpu.matmul %18, %19, %cst_19 {dimension_numbers = #tpu.dot_dimension_numbers<[1], [0], [0], [1], [0, 0, 1, 1], [], []>} : vector<16x256xf32>, vector<256x128xf32>, vector<16x128xf32> -> vector<16x128xf32>
    %21 = vector.extract_strided_slice %20 {offsets = [0, 0], sizes = [16, 1], strides = [1, 1]} : vector<16x128xf32> to vector<16x1xf32>
    %c0_20 = arith.constant 0 : index
    %c0_21 = arith.constant 0 : index
    %22 = vector.load %arg9[%c0_20, %c0_21] : memref<1x1xf32, #tpu.memory_space<vmem>>, vector<1x1xf32>
    %23 = vector.broadcast %22 : vector<1x1xf32> to vector<16x1xf32>
    %24 = arith.addf %21, %23 : vector<16x1xf32>
    %c0_22 = arith.constant 0 : index
    %c0_23 = arith.constant 0 : index
    %25 = vector.load %arg10[%c0_22, %c0_23] : memref<16x1xf32, #tpu.memory_space<vmem>>, vector<16x1xf32>
    tpu.vector_store %arg10[%c0_22, %c0_23], %24 {strides = array<i32>} : memref<16x1xf32, #tpu.memory_space<vmem>>, vector<16x1xf32>,
    return
  }
  func.func @transform_0(%arg0: i32) -> (i32, i32) {
    %c0_i32 = arith.constant 0 : i32
    %c0_i32_0 = arith.constant 0 : i32
    return %arg0, %c0_i32 : i32, i32
  }
  func.func @transform_1(%arg0: i32) -> (i32, i32) {
    %c0_i32 = arith.constant 0 : i32
    %c0_i32_0 = arith.constant 0 : i32
    return %arg0, %c0_i32 : i32, i32
  }
  func.func @transform_2(%arg0: i32) -> (i32, i32) {
    %c0_i32 = arith.constant 0 : i32
    %c0_i32_0 = arith.constant 0 : i32
    %c0_i32_1 = arith.constant 0 : i32
    return %c0_i32, %c0_i32_0 : i32, i32
  }
  func.func @transform_3(%arg0: i32) -> (i32, i32) {
    %c0_i32 = arith.constant 0 : i32
    %c0_i32_0 = arith.constant 0 : i32
    %c0_i32_1 = arith.constant 0 : i32
    return %c0_i32, %c0_i32_0 : i32, i32
  }
  func.func @transform_4(%arg0: i32) -> (i32, i32) {
    %c0_i32 = arith.constant 0 : i32
    %c0_i32_0 = arith.constant 0 : i32
    %c0_i32_1 = arith.constant 0 : i32
    return %c0_i32, %c0_i32_0 : i32, i32
  }
  func.func @transform_5(%arg0: i32) -> (i32, i32) {
    %c0_i32 = arith.constant 0 : i32
    %c0_i32_0 = arith.constant 0 : i32
    %c0_i32_1 = arith.constant 0 : i32
    return %c0_i32, %c0_i32_0 : i32, i32
  }
  func.func @transform_6(%arg0: i32) -> (i32, i32) {
    %c0_i32 = arith.constant 0 : i32
    %c0_i32_0 = arith.constant 0 : i32
    %c0_i32_1 = arith.constant 0 : i32
    return %c0_i32, %c0_i32_0 : i32, i32
  }
  func.func @transform_7(%arg0: i32) -> (i32, i32) {
    %c0_i32 = arith.constant 0 : i32
    %c0_i32_0 = arith.constant 0 : i32
    %c0_i32_1 = arith.constant 0 : i32
    return %c0_i32, %c0_i32_0 : i32, i32
  }
  func.func @transform_8(%arg0: i32) -> (i32, i32) {
    %c0_i32 = arith.constant 0 : i32
    %c0_i32_0 = arith.constant 0 : i32
    %c0_i32_1 = arith.constant 0 : i32
    return %c0_i32, %c0_i32_0 : i32, i32
  }
  func.func @transform_9(%arg0: i32) -> (i32, i32) {
    %c0_i32 = arith.constant 0 : i32
    %c0_i32_0 = arith.constant 0 : i32
    return %arg0, %c0_i32 : i32, i32
  }
}

</mosaic_0001>

<bundles_post_ra>
// kernel: critic_forward.1
= control target key start
LH: loop header
LB: loop body
LE: loop exit
PB: predicated region body
PF: predicated region fallthrough
CT: control target
= control target key end

     0   :  { %s1065_s0 = inlined_call_operand.vmem [shape: f32[16,59], index: 0, kind: input, shape index: {}]   ;;  %s1066_s1 = inlined_call_operand.vmem [shape: f32[16,29], index: 1, kind: input, shape index: {}]   ;;  %s1067_s2 = inlined_call_operand.hbm [shape: f32[59,256], index: 2, kind: input, shape index: {}]   ;;  %s1068_s3 = inlined_call_operand.hbm [shape: f32[29,256], index: 3, kind: input, shape index: {}]   ;;  %s1069_s4 = inlined_call_operand.vmem [shape: f32[1,256], index: 4, kind: input, shape index: {}]   ;;  %s1070_s5 = inlined_call_operand.hbm [shape: f32[256,256], index: 5, kind: input, shape index: {}]   ;;  %s1071_s6 = inlined_call_operand.vmem [shape: f32[1,256], index: 6, kind: input, shape index: {}]   ;;  %s1072_s7 = inlined_call_operand.hbm [shape: f32[256,128], index: 7, kind: input, shape index: {}]   ;;  %s1073_s8 = inlined_call_operand.<no memory space> [shape: f32[1,1], index: 8, kind: input, shape index: {}]   ;;  %s1074_s9 = inlined_call_operand.vmem [shape: f32[16,1], index: 9, kind: output, shape index: {}]  }
   0x1   :  { %v14_v0 = vstv %s1073_s8 }
   0x2   :  { %15 = vst [vmem:[#allocation2] sm:$0x1] %v14_v0 }
   0x3   :  { %16 = vsyncpa [#allocation4], 0 }
   0x4   :  { %17 = vsyncpa [#allocation6], 0 }
   0x5   :  { %18 = vsyncpa [#allocation9], 0  ;;  %s881_s11 = smov [#allocation5]   ;;  %s882_s13 = smov [#allocation3]  }
   0x6   :  { %s40_s12 = sshll.u32 %s881_s11, 4  ;;  %s28_s14 = sshll.u32 %s882_s13, 4  ;;  %s41_s12 = int_to_ptr.vmem [resolvable:$true] %s40_s12  ;;  %s944_s14 = int_to_ptr.vmem [resolvable:$true] %s28_s14 }
   0x7   :  { %s787_s17 = scalar_lea.hbm %s1068_s3, 1024 }
   0x8   :  { %p788_p0 = scmp.ne.s32.totalorder %s1068_s3, %s787_s17  ;;  %p791_p1 = scmp.lt.u32.totalorder %s787_s17, %s1068_s3 }
   0xa   :  { %p793_p2 = pnand %p791_p1, %p788_p0 }
   0xc   :  { %796 = shalt.err (!%p793_p2)
}
   0xd   :  { %s797_s21 = scalar_lea.vmem %s41_s12, 1024  ;;  %p802_p4 = scmp.lt.s32.totalorder %s41_s12, %s41_s12 }
   0xe   :  { %p798_p3 = scmp.ne.s32.totalorder %s41_s12, %s797_s21  ;;  %p803_p5 = scmp.lt.s32.totalorder %s797_s21, %s797_s21 }
  0x10   :  { %p804_p6 = por %p803_p5, %p802_p4 }
  0x12   :  { %p805_p7 = pnand %p804_p6, %p798_p3 }
  0x14   :  { %808 = shalt.err (!%p805_p7)
}
  0x15   :  { %s883_s22 = smov 256   ;;  %s884_s23 = smov 16  }
  0x16   :  { %46 = dma.hbm_to_vmem [thread:$0]  %s1068_s3, 1024, %s41_s12, [#allocation6], %s883_s22, %s883_s22, %s884_s23  }
  0x17   :  { %s809_s28 = scalar_lea.hbm %s1067_s2, 2048 }
  0x18   :  { %p810_p8 = scmp.ne.s32.totalorder %s1067_s2, %s809_s28  ;;  %p813_p9 = scmp.lt.u32.totalorder %s809_s28, %s1067_s2 }
  0x1a   :  { %p815_p10 = pnand %p813_p9, %p810_p8 }
  0x1c   :  { %818 = shalt.err (!%p815_p10)
}
  0x1d   :  { %s819_s13 = scalar_lea.vmem %s944_s14, 2048  ;;  %p824_p12 = scmp.lt.s32.totalorder %s944_s14, %s944_s14 }
  0x1e   :  { %p820_p11 = scmp.ne.s32.totalorder %s944_s14, %s819_s13  ;;  %p825_p13 = scmp.lt.s32.totalorder %s819_s13, %s819_s13 }
  0x20   :  { %p826_p0 = por %p825_p13, %p824_p12 }
  0x22   :  { %p827_p1 = pnand %p826_p0, %p820_p11 }
  0x24   :  { %830 = shalt.err (!%p827_p1)
}
  0x25   :  { %34 = dma.hbm_to_vmem [thread:$0]  %s1067_s2, 2048, %s944_s14, [#allocation4], %s883_s22, %s883_s22, %s884_s23  }
  0x26   :  { %s885_s15 = smov [#allocation7]   ;;  %s886_s17 = smov [#allocation8]  }
  0x27   :  { %s54_s16 = sshll.u32 %s885_s15, 4  ;;  %s68_s18 = sshll.u32 %s886_s17, 4  ;;  %s55_s16 = int_to_ptr.vmem [resolvable:$true] %s54_s16  ;;  %s981_s18 = int_to_ptr.vmem [resolvable:$true] %s68_s18 }
  0x28   :  { %s831_s20 = scalar_lea.hbm %s1070_s5, 8192 }
  0x29   :  { %p832_p2 = scmp.ne.s32.totalorder %s1070_s5, %s831_s20  ;;  %p835_p3 = scmp.lt.u32.totalorder %s831_s20, %s1070_s5 }
  0x2b   :  { %p837_p4 = pnand %p835_p3, %p832_p2 }
  0x2d   :  { %840 = shalt.err (!%p837_p4)
}
  0x2e   :  { %s841_s2 = scalar_lea.vmem %s55_s16, 8192  ;;  %p846_p6 = scmp.lt.s32.totalorder %s55_s16, %s55_s16 }
  0x2f   :  { %p842_p5 = scmp.ne.s32.totalorder %s55_s16, %s841_s2  ;;  %p847_p7 = scmp.lt.s32.totalorder %s841_s2, %s841_s2 }
  0x31   :  { %p848_p8 = por %p847_p7, %p846_p6 }
  0x33   :  { %p849_p9 = pnand %p848_p8, %p842_p5 }
  0x35   :  { %852 = shalt.err (!%p849_p9)
}
  0x36   :  { %60 = dma.hbm_to_vmem [thread:$0]  %s1070_s5, 8192, %s55_s16, [#allocation6], %s883_s22, %s883_s22, %s884_s23  }
  0x37   :  { %s853_s30 = scalar_lea.hbm %s1072_s7, 4096 }
  0x38   :  { %p854_p10 = scmp.ne.s32.totalorder %s1072_s7, %s853_s30  ;;  %p857_p11 = scmp.lt.u32.totalorder %s853_s30, %s1072_s7 }
  0x3a   :  { %p859_p12 = pnand %p857_p11, %p854_p10 }
  0x3c   :  { %862 = shalt.err (!%p859_p12)
}
  0x3d   :  { %s863_s12 = scalar_lea.vmem %s981_s18, 4096  ;;  %p868_p0 = scmp.lt.s32.totalorder %s981_s18, %s981_s18 }
  0x3e   :  { %p864_p13 = scmp.ne.s32.totalorder %s981_s18, %s863_s12  ;;  %p869_p1 = scmp.lt.s32.totalorder %s863_s12, %s863_s12 }
  0x40   :  { %p870_p2 = por %p869_p1, %p868_p0 }
  0x42   :  { %p871_p3 = pnand %p870_p2, %p864_p13 }
  0x44   :  { %874 = shalt.err (!%p871_p3)
}
  0x45   :  { %s887_s5 = smov 128   ;;  %s888_s22 = smov 8  }
  0x46   :  { %74 = dma.hbm_to_vmem [thread:$0]  %s1072_s7, 4096, %s981_s18, [#allocation9], %s887_s5, %s887_s5, %s888_s22  }
  0x47   :  { %875 = dma.done.wait [#allocation4], 2048  }
  0x48   :  { %876 = vsyncadd [#allocation4], 4294965248 }
  0x49   :  { %877 = dma.done.wait [#allocation6], 9216  }
  0x4a   :  { %878 = vsyncadd [#allocation6], 4294958080 }
  0x4b   :  { %879 = dma.done.wait [#allocation9], 4096  }
  0x4c   :  { %880 = vsyncadd [#allocation9], 4294963200  ;;  %v889_v1 = vmov 0.0   ;;  %vm124_vm0 = vcmask 1044480   ;;  %vm890_vm1 = vmmov 1   ;;  %v110_v3 = vld [vmem:[#allocation5 + $0x8] sm:$0xff] }
  0x4d   :  { %195 = vmatprep.mubr.f32.mxu0 %v889_v1  ;;  %vm1017_vm2 = vmpackc.low %vm124_vm0, %vm890_vm1  ;;  %v112_v4 = vld [vmem:[#allocation5 + $0x18] sm:$0xff]  ;;  %v109_v5 = vld [vmem:[#allocation5] sm:$0xff]  ;;  %vm117_vm3 = vcmask 236544   ;;  %vm215_vm4 = vcmask 1042432   ;;  %vm208_vm6 = vcmask 482304   ;;  %vm592_vm7 = vcmask 7168  }
  0x4e   :  { %v649_v6 = vpack.c.bf16 %v112_v4, %v110_v3  ;;  %v111_v7 = vld [vmem:[#allocation5 + $0x10] sm:$0xff]  ;;  %v114_v8 = vld [vmem:[#allocation5 + $0x28] sm:$0xff]  ;;  %v116_v9 = vld [vmem:[#allocation5 + $0x38] sm:$0x1f] }
  0x4f   :  { %v651_v10 = vpack.c.bf16 %v111_v7, %v109_v5  ;;  %v653_v11 = vpack.c.bf16 %v116_v9, %v114_v8  ;;  %v113_v12 = vld [vmem:[#allocation5 + $0x20] sm:$0xff]  ;;  %v115_v13 = vld [vmem:[#allocation5 + $0x30] sm:$0x1f]  ;;  %v94_v14 = vld [vmem:[#allocation3 + $0x8] sm:$0xff] }
  0x50   :  { %650 = vmatprep.subr.bf16.mxu0 %v649_v6  ;;  %v96_v15 = vld [vmem:[#allocation3 + $0x18] sm:$0xff]  ;;  %v656_v16 = vpack.c.bf16 %v115_v13, %v113_v12  ;;  %v93_v18 = vld [vmem:[#allocation3] sm:$0xff]  ;;  %v95_v19 = vld [vmem:[#allocation3 + $0x10] sm:$0xff] }
  0x51   :  { %652 = vmatpush1.bf16.msra.mxu0 %v651_v10  ;;  %v659_v17 = vpack.c.bf16 %v96_v15, %v94_v14  ;;  %v98_v20 = vld [vmem:[#allocation3 + $0x28] sm:$0xff]  ;;  %v100_v21 = vld [vmem:[#allocation3 + $0x38] sm:$0xff]  ;;  %v661_v23 = vpack.c.bf16 %v95_v19, %v93_v18  ;;  %v97_v24 = vld [vmem:[#allocation3 + $0x20] sm:$0xff] }
  0x52   :  { %655 = vmatprep.subr.msk.bf16.mxu0 %vm1017_vm2, %v653_v11  ;;  %v91_v22 = vld [vmem:[%s1066_s1] sm:$0xff]  ;;  %v99_v25 = vld [vmem:[#allocation3 + $0x30] sm:$0xff]  ;;  %v102_v26 = vld [vmem:[#allocation3 + $0x48] sm:$0xff]  ;;  %v663_v27 = vpack.c.bf16 %v100_v21, %v98_v20 }
  0x53   :  { %v104_v28 = vld [vmem:[#allocation3 + $0x58] sm:$0xff]  ;;  %v320_v29 = vld [vmem:[#allocation7 + $0x8] sm:$0xff]  ;;  %v319_v32 = vld [vmem:[#allocation7] sm:$0xff]  ;;  %v665_v39 = vpack.c.bf16 %v99_v25, %v97_v24 }
  0x54   :  { %v322_v30 = vld [vmem:[#allocation7 + $0x18] sm:$0xff]  ;;  %v321_v33 = vld [vmem:[#allocation7 + $0x10] sm:$0xff]  ;;  %v324_v34 = vld [vmem:[#allocation7 + $0x28] sm:$0xff]  ;;  %v667_v44 = vpack.c.bf16 %v104_v28, %v102_v26 }
  0x55   :  { %658 = vmatpush1.bf16.msk.msra.mxu0 %vm1017_vm2, %v656_v16  ;;  %v677_v31 = vpack.c.bf16 %v322_v30, %v320_v29  ;;  %v679_v35 = vpack.c.bf16 %v321_v33, %v319_v32  ;;  %v326_v36 = vld [vmem:[#allocation7 + $0x38] sm:$0xff]  ;;  %v323_v37 = vld [vmem:[#allocation7 + $0x20] sm:$0xff]  ;;  %v325_v38 = vld [vmem:[#allocation7 + $0x30] sm:$0xff] }
  0x56   :  { %660 = vmatprep.subr.bf16.mxu0 %v659_v17  ;;  %v92_v40 = vld [vmem:[%s1066_s1 + $0x8] sm:$0xff]  ;;  %v681_v41 = vpack.c.bf16 %v326_v36, %v324_v34  ;;  %v330_v43 = vld [vmem:[#allocation7 + $0x58] sm:$0xff]  ;;  %v103_v46 = vld [vmem:[#allocation3 + $0x50] sm:$0xff]  ;;  %v683_v49 = vpack.c.bf16 %v325_v38, %v323_v37 }
  0x57   :  { %v328_v42 = vld [vmem:[#allocation7 + $0x48] sm:$0xff]  ;;  %v101_v45 = vld [vmem:[#allocation3 + $0x40] sm:$0xff]  ;;  %678 = vmatprep.subr.bf16.mxu1 %v677_v31  ;;  %v108_v48 = vld [vmem:[#allocation3 + $0x78] sm:$0x7] }
  0x58   :  { %604 = vmatmul.mubr.msk.f32.vlgmr.msra.gmra.mrb[0].mxu0 %vm117_vm3, %v91_v22  ;;  %v106_v47 = vld [vmem:[#allocation3 + $0x68] sm:$0xff]  ;;  %680 = vmatpush1.bf16.msra.mxu1 %v679_v35  ;;  %v685_v50 = vpack.c.bf16 %v330_v43, %v328_v42  ;;  %v327_v51 = vld [vmem:[#allocation7 + $0x40] sm:$0xff]  ;;  %v329_v52 = vld [vmem:[#allocation7 + $0x50] sm:$0xff]  ;;  %v669_v53 = vpack.c.bf16 %v103_v46, %v101_v45 }
  0x59   :  { %662 = vmatpush1.bf16.msra.mxu0 %v661_v23  ;;  %201 = vmatprep.mubr.f32.mxu0 %v889_v1  ;;  %v332_v54 = vld [vmem:[#allocation7 + $0x68] sm:$0xff]  ;;  %v334_v55 = vld [vmem:[#allocation7 + $0x78] sm:$0xff]  ;;  %v671_v56 = vpack.c.bf16 %v108_v48, %v106_v47  ;;  %v105_v57 = vld [vmem:[#allocation3 + $0x60] sm:$0xff]  ;;  %v687_v60 = vpack.c.bf16 %v329_v52, %v327_v51 }
  0x5a   :  { %664 = vmatprep.subr.bf16.mxu0 %v663_v27  ;;  %682 = vmatprep.subr.bf16.mxu1 %v681_v41  ;;  %v107_v58 = vld [vmem:[#allocation3 + $0x70] sm:$0x7]  ;;  %vm1036_vm5 = vmpackc.low %vm215_vm4, %vm890_vm1  ;;  %v689_v61 = vpack.c.bf16 %v334_v55, %v332_v54  ;;  %v331_v62 = vld [vmem:[#allocation7 + $0x60] sm:$0xff] }
  0x5b   :  { %v333_v63 = vld [vmem:[#allocation7 + $0x70] sm:$0xff]  ;;  %v674_v0 = vpack.c.bf16 %v107_v58, %v105_v57  ;;  %v336_v2 = vld [vmem:[#allocation7 + $0x88] sm:$0xff]  ;;  %v338_v3 = vld [vmem:[#allocation7 + $0x98] sm:$0xff] }
  0x5c   :  { %605 = vmatmul.mubr.msk.f32.gmra.mrb[2].mxu0 %vm117_vm3, %v92_v40  ;;  %684 = vmatpush1.bf16.msra.mxu1 %v683_v49  ;;  %v691_v4 = vpack.c.bf16 %v333_v63, %v331_v62  ;;  %v693_v5 = vpack.c.bf16 %v338_v3, %v336_v2  ;;  %v335_v6 = vld [vmem:[#allocation7 + $0x80] sm:$0xff]  ;;  %v337_v7 = vld [vmem:[#allocation7 + $0x90] sm:$0xff]  ;;  %v340_v9 = vld [vmem:[#allocation7 + $0xa8] sm:$0xff] }
  0x5d   :  { %666 = vmatpush1.bf16.msra.mxu0 %v665_v39  ;;  %286 = vmatprep.mubr.f32.mxu0 %v889_v1  ;;  %v89_v8 = vld [vmem:[%s1065_s0] sm:$0xff]  ;;  %v695_v11 = vpack.c.bf16 %v337_v7, %v335_v6  ;;  %v341_v14 = vld [vmem:[#allocation7 + $0xb0] sm:$0xff]  ;;  %v90_v15 = vld [vmem:[%s1065_s0 + $0x8] sm:$0xff] }
  0x5e   :  { %668 = vmatprep.subr.bf16.mxu0 %v667_v44  ;;  %686 = vmatprep.subr.bf16.mxu1 %v685_v50  ;;  %v342_v10 = vld [vmem:[#allocation7 + $0xb8] sm:$0xff]  ;;  %v339_v13 = vld [vmem:[#allocation7 + $0xa0] sm:$0xff]  ;;  %v344_v16 = vld [vmem:[#allocation7 + $0xc8] sm:$0xff] }
  0x5f   :  { %v697_v12 = vpack.c.bf16 %v342_v10, %v340_v9  ;;  %v346_v17 = vld [vmem:[#allocation7 + $0xd8] sm:$0xff]  ;;  %v699_v18 = vpack.c.bf16 %v341_v14, %v339_v13  ;;  %v343_v20 = vld [vmem:[#allocation7 + $0xc0] sm:$0xff]  ;;  %v345_v21 = vld [vmem:[#allocation7 + $0xd0] sm:$0xff] }
  0x60   :  { %688 = vmatpush1.bf16.msra.mxu1 %v687_v60  ;;  %v701_v19 = vpack.c.bf16 %v346_v17, %v344_v16  ;;  %v348_v22 = vld [vmem:[#allocation7 + $0xe8] sm:$0xff]  ;;  %v350_v23 = vld [vmem:[#allocation7 + $0xf8] sm:$0xff]  ;;  %v703_v24 = vpack.c.bf16 %v345_v21, %v343_v20  ;;  %v347_v25 = vld [vmem:[#allocation7 + $0xe0] sm:$0xff] }
  0x61   :  { %670 = vmatpush1.bf16.msra.mxu0 %v669_v53  ;;  %690 = vmatprep.subr.bf16.mxu1 %v689_v61  ;;  %v349_v26 = vld [vmem:[#allocation7 + $0xf0] sm:$0xff]  ;;  %v352_v27 = vld [vmem:[#allocation7 + $0x108] sm:$0xff]  ;;  %v354_v28 = vld [vmem:[#allocation7 + $0x118] sm:$0xff] }
  0x62   :  { %673 = vmatprep.subr.msk.bf16.mxu0 %vm1036_vm5, %v671_v56  ;;  %v707_v29 = vpack.c.bf16 %v349_v26, %v347_v25  ;;  %v709_v30 = vpack.c.bf16 %v354_v28, %v352_v27  ;;  %v351_v31 = vld [vmem:[#allocation7 + $0x100] sm:$0xff]  ;;  %v353_v32 = vld [vmem:[#allocation7 + $0x110] sm:$0xff]  ;;  %v356_v33 = vld [vmem:[#allocation7 + $0x128] sm:$0xff] }
  0x63   :  { %v358_v34 = vld [vmem:[#allocation7 + $0x138] sm:$0xff]  ;;  %v711_v35 = vpack.c.bf16 %v353_v32, %v351_v31  ;;  %v355_v37 = vld [vmem:[#allocation7 + $0x120] sm:$0xff]  ;;  %v357_v38 = vld [vmem:[#allocation7 + $0x130] sm:$0xff] }
  0x64   :  { %692 = vmatpush1.bf16.msra.mxu1 %v691_v4  ;;  %v713_v36 = vpack.c.bf16 %v358_v34, %v356_v33  ;;  %v360_v39 = vld [vmem:[#allocation7 + $0x148] sm:$0xff]  ;;  %v362_v40 = vld [vmem:[#allocation7 + $0x158] sm:$0xff]  ;;  %v715_v41 = vpack.c.bf16 %v357_v38, %v355_v37  ;;  %v359_v43 = vld [vmem:[#allocation7 + $0x140] sm:$0xff] }
  0x65   :  { %676 = vmatpush1.bf16.msk.msra.mxu0 %vm1036_vm5, %v674_v0  ;;  %694 = vmatprep.subr.bf16.mxu1 %v693_v5  ;;  %v717_v42 = vpack.c.bf16 %v362_v40, %v360_v39  ;;  %v361_v44 = vld [vmem:[#allocation7 + $0x150] sm:$0xff]  ;;  %v364_v45 = vld [vmem:[#allocation7 + $0x168] sm:$0xff]  ;;  %v366_v46 = vld [vmem:[#allocation7 + $0x178] sm:$0xff] }
  0x66   :  { %v719_v47 = vpack.c.bf16 %v361_v44, %v359_v43  ;;  %v721_v48 = vpack.c.bf16 %v366_v46, %v364_v45  ;;  %v363_v49 = vld [vmem:[#allocation7 + $0x160] sm:$0xff]  ;;  %v365_v50 = vld [vmem:[#allocation7 + $0x170] sm:$0xff]  ;;  %v368_v51 = vld [vmem:[#allocation7 + $0x188] sm:$0xff] }
  0x67   :  { %v370_v52 = vld [vmem:[#allocation7 + $0x198] sm:$0xff]  ;;  %v723_v53 = vpack.c.bf16 %v365_v50, %v363_v49  ;;  %v367_v55 = vld [vmem:[#allocation7 + $0x180] sm:$0xff]  ;;  %v369_v56 = vld [vmem:[#allocation7 + $0x190] sm:$0xff] }
  0x68   :  { %608 = vmatmul.mubr.msk.f32.vlgmr.msra.gmra.mrb[0].mxu0 %vm208_vm6, %v89_v8  ;;  %696 = vmatpush1.bf16.msra.mxu1 %v695_v11  ;;  %v725_v54 = vpack.c.bf16 %v370_v52, %v368_v51  ;;  %v372_v57 = vld [vmem:[#allocation7 + $0x1a8] sm:$0xff]  ;;  %v374_v58 = vld [vmem:[#allocation7 + $0x1b8] sm:$0xff]  ;;  %v727_v59 = vpack.c.bf16 %v369_v56, %v367_v55  ;;  %v371_v61 = vld [vmem:[#allocation7 + $0x1a0] sm:$0xff]  ;;  %v301_v51 = vlaneseq }
  0x69   :  { %292 = vmatprep.mubr.f32.mxu0 %v889_v1  ;;  %698 = vmatprep.subr.bf16.mxu1 %v697_v12  ;;  %v705_v1 = vpack.c.bf16 %v350_v23, %v348_v22  ;;  %v729_v60 = vpack.c.bf16 %v374_v58, %v372_v57  ;;  %v373_v62 = vld [vmem:[#allocation7 + $0x1b0] sm:$0xff]  ;;  %v376_v63 = vld [vmem:[#allocation7 + $0x1c8] sm:$0xff]  ;;  %v378_v0 = vld [vmem:[#allocation7 + $0x1d8] sm:$0xff] }
  0x6a   :  { %v731_v2 = vpack.c.bf16 %v373_v62, %v371_v61  ;;  %v733_v3 = vpack.c.bf16 %v378_v0, %v376_v63  ;;  %v375_v4 = vld [vmem:[#allocation7 + $0x1c0] sm:$0xff]  ;;  %v377_v5 = vld [vmem:[#allocation7 + $0x1d0] sm:$0xff]  ;;  %v380_v7 = vld [vmem:[#allocation7 + $0x1e8] sm:$0xff]  ;;  %v302_v52 = vshrl.u32 %v301_v51, 7 }
  0x6b   :  { %v735_v6 = vpack.c.bf16 %v377_v5, %v375_v4  ;;  %v382_v8 = vld [vmem:[#allocation7 + $0x1f8] sm:$0xff]  ;;  %v379_v10 = vld [vmem:[#allocation7 + $0x1e0] sm:$0xff]  ;;  %v381_v11 = vld [vmem:[#allocation7 + $0x1f0] sm:$0xff] }
  0x6c   :  { %609 = vmatmul.mubr.msk.f32.gmra.mrb[2].mxu0 %vm208_vm6, %v90_v15  ;;  %700 = vmatpush1.bf16.msra.mxu1 %v699_v18  ;;  %v737_v9 = vpack.c.bf16 %v382_v8, %v380_v7  ;;  %v739_v12 = vpack.c.bf16 %v381_v11, %v379_v10  ;;  %v492_v13 = vld [vmem:[#allocation8 + $0x80] sm:$0xff]  ;;  %v493_v14 = vld [vmem:[#allocation8 + $0x88] sm:$0xff]  ;;  %v494_v18 = vld [vmem:[#allocation8 + $0x90] sm:$0xff]  ;;  %v307_v55 = vsub.s32 1, %v302_v52 }
  0x6d   :  { %702 = vmatprep.subr.bf16.mxu1 %v701_v19  ;;  %v476_v15 = vld [vmem:[#allocation8] sm:$0xff]  ;;  %v741_v16 = vpack.c.bf16 %v493_v14, %v492_v13  ;;  %v477_v17 = vld [vmem:[#allocation8 + $0x8] sm:$0xff]  ;;  %v495_v19 = vld [vmem:[#allocation8 + $0x98] sm:$0xff] }
  0x6e   :  { %v743_v20 = vpack.c.bf16 %v477_v17, %v476_v15  ;;  %v745_v21 = vpack.c.bf16 %v495_v19, %v494_v18  ;;  %v478_v22 = vld [vmem:[#allocation8 + $0x10] sm:$0xff]  ;;  %v479_v23 = vld [vmem:[#allocation8 + $0x18] sm:$0xff]  ;;  %v480_v27 = vld [vmem:[#allocation8 + $0x20] sm:$0xff] }
  0x6f   :  { %742 = vmatprep.subr.bf16.mxu0 %v741_v16  ;;  %v747_v25 = vpack.c.bf16 %v479_v23, %v478_v22  ;;  %v481_v28 = vld [vmem:[#allocation8 + $0x28] sm:$0xff]  ;;  %v482_v33 = vld [vmem:[#allocation8 + $0x30] sm:$0xff]  ;;  %v483_v34 = vld [vmem:[#allocation8 + $0x38] sm:$0xff] }
  0x70   :  { %704 = vmatpush1.bf16.msra.mxu1 %v703_v24  ;;  %v496_v24 = vld [vmem:[#allocation8 + $0xa0] sm:$0xff]  ;;  %744 = vmatpush3.bf16.msra.mxu0 %v743_v20  ;;  %v751_v31 = vpack.c.bf16 %v481_v28, %v480_v27  ;;  %v755_v37 = vpack.c.bf16 %v483_v34, %v482_v33  ;;  %v485_v40 = vld [vmem:[#allocation8 + $0x48] sm:$0xff]  ;;  %v486_v45 = vld [vmem:[#allocation8 + $0x50] sm:$0xff] }
  0x71   :  { %706 = vmatprep.subr.bf16.mxu1 %v705_v1  ;;  %v497_v1 = vld [vmem:[#allocation8 + $0xa8] sm:$0xff]  ;;  %746 = vmatprep.subr.bf16.mxu0 %v745_v21  ;;  %v484_v39 = vld [vmem:[#allocation8 + $0x40] sm:$0xff]  ;;  %v487_v46 = vld [vmem:[#allocation8 + $0x58] sm:$0xff] }
  0x72   :  { %v749_v26 = vpack.c.bf16 %v497_v1, %v496_v24  ;;  %v759_v43 = vpack.c.bf16 %v485_v40, %v484_v39  ;;  %v763_v49 = vpack.c.bf16 %v487_v46, %v486_v45  ;;  %v488_v7 = vld [vmem:[#allocation8 + $0x60] sm:$0xff]  ;;  %v489_v8 = vld [vmem:[#allocation8 + $0x68] sm:$0xff]  ;;  %v506_v10 = vld [vmem:[#allocation8 + $0xf0] sm:$0xff] }
  0x73   :  { %v507_v11 = vld [vmem:[#allocation8 + $0xf8] sm:$0xff]  ;;  %v490_v13 = vld [vmem:[#allocation8 + $0x70] sm:$0xff] }
  0x74   :  { %708 = vmatpush1.bf16.msra.mxu1 %v707_v29  ;;  %v498_v29 = vld [vmem:[#allocation8 + $0xb0] sm:$0xff]  ;;  %748 = vmatpush3.bf16.msra.mxu0 %v747_v25  ;;  %v491_v14 = vld [vmem:[#allocation8 + $0x78] sm:$0xff] }
  0x75   :  { %710 = vmatprep.subr.bf16.mxu1 %v709_v30  ;;  %v499_v30 = vld [vmem:[#allocation8 + $0xb8] sm:$0xff]  ;;  %750 = vmatprep.subr.bf16.mxu0 %v749_v26  ;;  %v771_v15 = vpack.c.bf16 %v491_v14, %v490_v13 }
  0x76   :  { %v753_v32 = vpack.c.bf16 %v499_v30, %v498_v29  ;;  %v383_v16 = vld [vmem:[%s1071_s6] sm:$0x3] }
  0x77   :  { %v392_v18 = vrot.slane %v383_v16, %v307_v55 }
  0x78   :  { %712 = vmatpush1.bf16.msra.mxu1 %v711_v35  ;;  %v500_v35 = vld [vmem:[#allocation8 + $0xc0] sm:$0xff]  ;;  %752 = vmatpush3.bf16.msra.mxu0 %v751_v31 }
  0x79   :  { %714 = vmatprep.subr.bf16.mxu1 %v713_v36  ;;  %v501_v36 = vld [vmem:[#allocation8 + $0xc8] sm:$0xff]  ;;  %754 = vmatprep.subr.bf16.mxu0 %v753_v32  ;;  %v610_v32 = vld [vmem:[#allocation2] ss:$0 sm:$0xff] }
  0x7a   :  { %v757_v38 = vpack.c.bf16 %v501_v36, %v500_v35 }
  0x7c   :  { %716 = vmatpush1.bf16.msra.mxu1 %v715_v41  ;;  %v502_v41 = vld [vmem:[#allocation8 + $0xd0] sm:$0xff]  ;;  %756 = vmatpush3.bf16.msra.mxu0 %v755_v37 }
  0x7d   :  { %718 = vmatprep.subr.bf16.mxu1 %v717_v42  ;;  %v503_v42 = vld [vmem:[#allocation8 + $0xd8] sm:$0xff]  ;;  %758 = vmatprep.subr.bf16.mxu0 %v757_v38 }
  0x7e   :  { %v761_v44 = vpack.c.bf16 %v503_v42, %v502_v41 }
  0x80   :  { %720 = vmatpush1.bf16.msra.mxu1 %v719_v47  ;;  %v504_v47 = vld [vmem:[#allocation8 + $0xe0] sm:$0xff]  ;;  %760 = vmatpush3.bf16.msra.mxu0 %v759_v43 }
  0x81   :  { %722 = vmatprep.subr.bf16.mxu1 %v721_v48  ;;  %v505_v48 = vld [vmem:[#allocation8 + $0xe8] sm:$0xff]  ;;  %762 = vmatprep.subr.bf16.mxu0 %v761_v44 }
  0x82   :  { %v765_v50 = vpack.c.bf16 %v505_v48, %v504_v47 }
  0x84   :  { %724 = vmatpush1.bf16.msra.mxu1 %v723_v53  ;;  %764 = vmatpush3.bf16.msra.mxu0 %v763_v49  ;;  %v303_v53 = vsub.s32 0, %v302_v52 }
  0x85   :  { %726 = vmatprep.subr.bf16.mxu1 %v725_v54  ;;  %766 = vmatprep.subr.bf16.mxu0 %v765_v50  ;;  %v299_v54 = vld [vmem:[%s1069_s4] sm:$0x3] }
  0x86   :  { %v304_v56 = vrot.slane %v299_v54, %v303_v53  ;;  %v308_v57 = vrot.slane %v299_v54, %v307_v55  ;;  %v388_v17 = vrot.slane %v383_v16, %v303_v53 }
  0x88   :  { %728 = vmatpush1.bf16.msra.mxu1 %v727_v59 }
  0x89   :  { %730 = vmatprep.subr.bf16.mxu1 %v729_v60 }
  0x8c   :  { %732 = vmatpush1.bf16.msra.mxu1 %v731_v2 }
  0x8d   :  { %734 = vmatprep.subr.bf16.mxu1 %v733_v3 }
  0x90   :  { %736 = vmatpush1.bf16.msra.mxu1 %v735_v6 }
  0x91   :  { %738 = vmatprep.subr.bf16.mxu1 %v737_v9  ;;  %v767_v9 = vpack.c.bf16 %v489_v8, %v488_v7 }
  0x93   :  { %768 = vmatpush3.bf16.msra.mxu0 %v767_v9 }
  0x94   :  { %740 = vmatpush1.bf16.msra.mxu1 %v739_v12  ;;  %v769_v12 = vpack.c.bf16 %v507_v11, %v506_v10 }
  0x96   :  { %770 = vmatprep.subr.bf16.mxu0 %v769_v12 }
  0x97   :  { %772 = vmatpush3.bf16.msra.mxu0 %v771_v15 }
 0x13b   :  { %v288_v58 = vpop.f32.mrb[0].mxu0 }
 0x13c   :  { %v311_v59 = vadd.f32 %v304_v56, %v288_v58  ;;  %v290_v60 = vpop.f32.mrb[1].mxu0 }
 0x13d   :  { %v312_v61 = vadd.f32 %v308_v57, %v290_v60 }
 0x13e   :  { %v315_v0 = vmax.f32 %v311_v59, 0.0 }
 0x13f   :  { %v294_v62 = vpop.f32.mrb[2].mxu0  ;;  %v316_v63 = vmax.f32 %v312_v61, 0.0 }
 0x140   :  { %v313_v2 = vadd.f32 %v304_v56, %v294_v62  ;;  %v296_v3 = vpop.f32.mrb[3].mxu0 }
 0x141   :  { %v314_v4 = vadd.f32 %v308_v57, %v296_v3  ;;  %459 = vmatprep.mubr.f32.mxu1 %v316_v63 }
 0x142   :  { %460 = vmatmul.mubr.f32.vlgmr.msra.gmra.mrb[0].mxu1 %v315_v0  ;;  %v317_v6 = vmax.f32 %v313_v2, 0.0 }
 0x143   :  { %v318_v5 = vmax.f32 %v314_v4, 0.0 }
 0x145   :  { %465 = vmatprep.mubr.f32.mxu1 %v318_v5 }
 0x146   :  { %466 = vmatmul.mubr.f32.gmra.mrb[2].mxu1 %v317_v6 }
 0x215   :  { %v461_v19 = vpop.f32.mrb[0].mxu1 }
 0x216   :  { %v462_v20 = vadd.f32 %v461_v19, %v388_v17  ;;  %v463_v21 = vpop.f32.mrb[1].mxu1 }
 0x217   :  { %v464_v22 = vadd.f32 %v463_v21, %v392_v18 }
 0x218   :  { %v472_v1 = vmax.f32 %v462_v20, 0.0 }
 0x219   :  { %v473_v23 = vmax.f32 %v464_v22, 0.0  ;;  %v467_v24 = vpop.f32.mrb[2].mxu1 }
 0x21a   :  { %v468_v25 = vadd.f32 %v467_v24, %v388_v17  ;;  %v469_v26 = vpop.f32.mrb[3].mxu1 }
 0x21b   :  { %v470_v27 = vadd.f32 %v469_v26, %v392_v18  ;;  %572 = vmatprep.mubr.f32.mxu0 %v473_v23 }
 0x21c   :  { %573 = vmatmul.mubr.f32.vlgmr.msra.gmra.mrb[4].mxu0 %v472_v1  ;;  %v474_v29 = vmax.f32 %v468_v25, 0.0 }
 0x21d   :  { %v475_v28 = vmax.f32 %v470_v27, 0.0 }
 0x21f   :  { %577 = vmatprep.mubr.f32.mxu0 %v475_v28 }
 0x220   :  { %578 = vmatmul.mubr.f32.gmra.mrb[6].mxu0 %v474_v29 }
 0x2ef   :  { %v643_v30 = vpop.f32.mrb[4].mxu0 }
 0x2f0   :  { %v644_v31 = vpop.f32.mrb[5].mxu0 }
 0x2f1   :  { %v645_v33 = vadd.f32 %v644_v31, %v643_v30 }
 0x2f3   :  { %v590_v34 = vadd.f32 %v645_v33, %v610_v32  ;;  %v646_v35 = vpop.f32.mrb[6].mxu0 }
 0x2f4   :  { %v647_v36 = vpop.f32.mrb[7].mxu0 }
 0x2f5   :  { %593 = vst.msk [vmem:[%s1074_s9] sm:$0xff] %vm592_vm7, %v590_v34  ;;  %v648_v37 = vadd.f32 %v647_v36, %v646_v35 }
 0x2f7   :  { %v591_v38 = vadd.f32 %v648_v37, %v610_v32 }
 0x2f9   :  { %594 = vst.msk [vmem:[%s1074_s9 + $0x8] sm:$0xff] %vm592_vm7, %v591_v38 }
 0x2fa   :  { %599 = vsyncpa [#allocation4], 1 }
 0x2fb   :  { %600 = vsyncpa [#allocation6], 1 }
 0x2fc   :  { %601 = vsyncpa [#allocation9], 1 }

</bundles_post_ra>
